<compile_context>
chip_gen: v7x
topology: tpu7x:2x2x1
jax: 0.10.0
libtpu: 0.0.40
codegen_flags: <defaults>
</compile_context>

<pallas_src>
import jax
import jax.numpy as jnp
from jax.experimental import pallas as pl
from jax.experimental.pallas import tpu as pltpu


def _round_up(a, b):
    return (a + b - 1) // b * b


def _pick_tile(total, base, max_tile):
    """Largest multiple of `base` that divides `total`, capped at `max_tile`."""
    best = base
    cap = min(total, max_tile)
    t = base
    while t <= cap:
        if total % t == 0:
            best = t
        t += base
    return best


def hpool_kernel(tau_ref, x_ref, dcoeff_ref, out_ref):
    # tau_ref   : SMEM (B,)      lower bin edges tau[0..B-1] (scalar prefetch)
    # x_ref     : VMEM (tm, tl)  tile of flattened rows (row = (n, c) pair)
    # dcoeff_ref: VMEM (tm, B)   per-row coefficient differences
    # out_ref   : VMEM (tm, 1)   per-row output (acts as accumulator over lane tiles)
    li = pl.program_id(1)

    @pl.when(li == 0)
    def _():
        out_ref[...] = jnp.zeros_like(out_ref)

    x = x_ref[...]                      # (tm, tl) f32
    dcoeff = dcoeff_ref[...]            # (tm, B)  f32
    num_bins = dcoeff.shape[1]

    # Per-element weight via cumulative (Abel) masks:
    #   w[r, j] = sum_b dcoeff[r, b] * (x[r, j] >= tau[b]) == coeff[r, bin(x[r, j])]
    # (elements below tau[0] — only padding lanes — get weight 0).
    w = jnp.zeros_like(x)
    for b in range(num_bins):
        w = w + jnp.where(x >= tau_ref[b], dcoeff[:, b:b + 1], 0.0)

    t = jnp.tanh(x)
    # Single cross-lane reduction per tile; accumulate into the resident output block.
    out_ref[...] += jnp.sum(t * w, axis=-1, keepdims=True)


def hpool_forward(x, coeff, *, tm_max=256, tl_max=2048):
    """x: (N, C, H, W) float32, coeff: (C, num_bins) float32 -> (N, C) float32."""
    N, C, H, W = x.shape
    B = coeff.shape[1]
    L = H * W
    M = N * C

    xr = x.reshape(M, L).astype(jnp.float32)
    coeff = coeff.astype(jnp.float32)

    # Global bin edges (same linspace formula as the reference); only the lower
    # edges tau[0..B-1] are needed with cumulative masks.
    # NOTE: this is one extra HBM pass over x — acceptable while the kernel is
    # compute-bound; fuse into a first-pass reduction only if it shows up.
    x_min = jnp.min(xr)
    x_max = jnp.max(xr)
    tau = x_min + (x_max - x_min) * (
        jnp.arange(B, dtype=jnp.float32) / jnp.float32(B)
    )

    # Abel summation: dcoeff[:, 0] = coeff[:, 0], dcoeff[:, b] = coeff[:, b] - coeff[:, b-1]
    dcoeff = jnp.concatenate([coeff[:, :1], coeff[:, 1:] - coeff[:, :-1]], axis=1)  # (C, B)
    dcoeff_rows = jnp.tile(dcoeff, (N, 1))                                          # (M, B)

    # Pad rows to a multiple of 8 (sublanes) and lanes to a multiple of 128.
    # Padded lanes use -inf: all masks are false -> weight 0 -> zero contribution.
    Mp = _round_up(M, 8)
    Lp = _round_up(L, 128)
    if Lp != L:
        xr = jnp.pad(xr, ((0, 0), (0, Lp - L)), constant_values=-jnp.inf)
    if Mp != M:
        xr = jnp.pad(xr, ((0, Mp - M), (0, 0)), constant_values=-jnp.inf)
        dcoeff_rows = jnp.pad(dcoeff_rows, ((0, Mp - M), (0, 0)))

    tm = _pick_tile(Mp, 8, tm_max)       # row tile (sublanes)
    tl = _pick_tile(Lp, 128, tl_max)     # lane tile; double-buffered x tile <= 2 MiB

    out = pl.pallas_call(
        hpool_kernel,
        out_shape=jax.ShapeDtypeStruct((Mp, 1), jnp.float32),
        grid_spec=pltpu.PrefetchScalarGridSpec(
            num_scalar_prefetch=1,                       # tau -> SMEM
            grid=(Mp // tm, Lp // tl),                   # reduction (lane) axis last
            in_specs=[
                pl.BlockSpec((tm, tl), lambda mi, li, tau: (mi, li)),
                pl.BlockSpec((tm, B), lambda mi, li, tau: (mi, 0)),
            ],
            out_specs=pl.BlockSpec((tm, 1), lambda mi, li, tau: (mi, 0)),
        ),
        compiler_params=pltpu.CompilerParams(
            dimension_semantics=("parallel", "arbitrary"),
            vmem_limit_bytes=32 * 1024 * 1024,           # safe on v5e/v6e/v7x
        ),
    )(tau, xr, dcoeff_rows)

    return out[:M, 0].reshape(N, C)


def hpool_ref(x, coeff):
    """Pure-JAX reference of the element-wise soft-histogram semantics."""
    N, C, H, W = x.shape
    B = coeff.shape[1]
    xr = x.reshape(N, C, H * W).astype(jnp.float32)
    x_min, x_max = jnp.min(xr), jnp.max(xr)
    tau = x_min + (x_max - x_min) * (jnp.arange(B + 1, dtype=jnp.float32) / B)
    t = jnp.tanh(xr)
    z = jnp.zeros((N, C), jnp.float32)
    for b in range(B):
        if b < B - 1:
            mask = (xr >= tau[b]) & (xr < tau[b + 1])
        else:
            mask = xr >= tau[b]
        hist = jnp.sum(jnp.where(mask, t, 0.0), axis=2)
        z = z + hist * coeff[:, b]
    return z


if __name__ == "__main__":
    key = jax.random.PRNGKey(0)
    kx, kc = jax.random.split(key)

    N, C, H, W = 2, 4, 16, 16
    num_bins = 8

    x = jax.random.normal(kx, (N, C, H, W), dtype=jnp.float32)
    # coeff ~ torch.rand(channels, num_bins): uniform [0, 1)
    coeff = jax.random.uniform(kc, (C, num_bins), dtype=jnp.float32)

    z = hpool_forward(x, coeff)
    jax.block_until_ready(z)

    assert z.shape == (N, C), z.shape
    z_ref = hpool_ref(x, coeff)
    assert jnp.allclose(z, z_ref, rtol=1e-3, atol=1e-3), (z, z_ref)

    print("KERNEL_OK")
</pallas_src>

<mosaic_0001>
module attributes {stable_mosaic.version = 11 : i64} {
  func.func @hpool_kernel(%arg0: i32, %arg1: i32, %arg2: memref<8xf32, #tpu.memory_space<smem>>, %arg3: memref<8x256xf32, #tpu.memory_space<vmem>>, %arg4: memref<8x8xf32, #tpu.memory_space<vmem>>, %arg5: memref<8x1xf32, #tpu.memory_space<vmem>>) attributes {dimension_semantics = [#tpu.dimension_semantics<parallel>, #tpu.dimension_semantics<arbitrary>], iteration_bounds = array<i64: 1, 1>, scalar_prefetch = 1 : i64, scratch_operands = 0 : i64, tpu.core_type = #tpu.core_type<tc>, window_params = [{transform_indices = @transform_0, window_bounds = array<i64: 8, 256>}, {transform_indices = @transform_1, window_bounds = array<i64: 8, 8>}, {transform_indices = @transform_2, window_bounds = array<i64: 8, 1>}]} {
    %c0_i32 = arith.constant 0 : i32
    %0 = arith.cmpi eq, %arg1, %c0_i32 : i32
    %1 = arith.extui %0 : i1 to i32
    %c0_i32_0 = arith.constant 0 : i32
    %2 = arith.cmpi ne, %1, %c0_i32_0 : i32
    scf.if %2 {
      %cst_18 = arith.constant 0.000000e+00 : f32
      %85 = vector.broadcast %cst_18 : f32 to vector<8x1xf32>
      %c0_19 = arith.constant 0 : index
      %c0_20 = arith.constant 0 : index
      %86 = vector.load %arg5[%c0_19, %c0_20] : memref<8x1xf32, #tpu.memory_space<vmem>>, vector<8x1xf32>
      tpu.vector_store %arg5[%c0_19, %c0_20], %85 {strides = array<i32>} : memref<8x1xf32, #tpu.memory_space<vmem>>, vector<8x1xf32>,
    } else {
    }
    %c0 = arith.constant 0 : index
    %c0_1 = arith.constant 0 : index
    %3 = vector.load %arg3[%c0, %c0_1] : memref<8x256xf32, #tpu.memory_space<vmem>>, vector<8x256xf32>
    %c0_2 = arith.constant 0 : index
    %c0_3 = arith.constant 0 : index
    %4 = vector.load %arg4[%c0_2, %c0_3] : memref<8x8xf32, #tpu.memory_space<vmem>>, vector<8x8xf32>
    %cst = arith.constant 0.000000e+00 : f32
    %5 = vector.broadcast %cst : f32 to vector<8x256xf32>
    %c0_4 = arith.constant 0 : index
    %6 = memref.load %arg2[%c0_4] : memref<8xf32, #tpu.memory_space<smem>>
    %7 = vector.broadcast %6 : f32 to vector<8x256xf32>
    %8 = arith.cmpf oge, %3, %7 : vector<8x256xf32>
    %9 = vector.extract_strided_slice %4 {offsets = [0, 0], sizes = [8, 1], strides = [1, 1]} : vector<8x8xf32> to vector<8x1xf32>
    %cst_5 = arith.constant 0.000000e+00 : f32
    %10 = vector.shape_cast %9 : vector<8x1xf32> to vector<8x1xf32>
    %11 = vector.broadcast %10 : vector<8x1xf32> to vector<8x256xf32>
    %12 = vector.broadcast %cst_5 : f32 to vector<8x256xf32>
    %13 = arith.select %8, %11, %12 : vector<8x256xi1>, vector<8x256xf32>
    %14 = arith.addf %5, %13 : vector<8x256xf32>
    %c1 = arith.constant 1 : index
    %15 = memref.load %arg2[%c1] : memref<8xf32, #tpu.memory_space<smem>>
    %16 = vector.broadcast %15 : f32 to vector<8x256xf32>
    %17 = arith.cmpf oge, %3, %16 : vector<8x256xf32>
    %18 = vector.extract_strided_slice %4 {offsets = [0, 1], sizes = [8, 1], strides = [1, 1]} : vector<8x8xf32> to vector<8x1xf32>
    %cst_6 = arith.constant 0.000000e+00 : f32
    %19 = vector.shape_cast %18 : vector<8x1xf32> to vector<8x1xf32>
    %20 = vector.broadcast %19 : vector<8x1xf32> to vector<8x256xf32>
    %21 = vector.broadcast %cst_6 : f32 to vector<8x256xf32>
    %22 = arith.select %17, %20, %21 : vector<8x256xi1>, vector<8x256xf32>
    %23 = arith.addf %14, %22 : vector<8x256xf32>
    %c2 = arith.constant 2 : index
    %24 = memref.load %arg2[%c2] : memref<8xf32, #tpu.memory_space<smem>>
    %25 = vector.broadcast %24 : f32 to vector<8x256xf32>
    %26 = arith.cmpf oge, %3, %25 : vector<8x256xf32>
    %27 = vector.extract_strided_slice %4 {offsets = [0, 2], sizes = [8, 1], strides = [1, 1]} : vector<8x8xf32> to vector<8x1xf32>
    %cst_7 = arith.constant 0.000000e+00 : f32
    %28 = vector.shape_cast %27 : vector<8x1xf32> to vector<8x1xf32>
    %29 = vector.broadcast %28 : vector<8x1xf32> to vector<8x256xf32>
    %30 = vector.broadcast %cst_7 : f32 to vector<8x256xf32>
    %31 = arith.select %26, %29, %30 : vector<8x256xi1>, vector<8x256xf32>
    %32 = arith.addf %23, %31 : vector<8x256xf32>
    %c3 = arith.constant 3 : index
    %33 = memref.load %arg2[%c3] : memref<8xf32, #tpu.memory_space<smem>>
    %34 = vector.broadcast %33 : f32 to vector<8x256xf32>
    %35 = arith.cmpf oge, %3, %34 : vector<8x256xf32>
    %36 = vector.extract_strided_slice %4 {offsets = [0, 3], sizes = [8, 1], strides = [1, 1]} : vector<8x8xf32> to vector<8x1xf32>
    %cst_8 = arith.constant 0.000000e+00 : f32
    %37 = vector.shape_cast %36 : vector<8x1xf32> to vector<8x1xf32>
    %38 = vector.broadcast %37 : vector<8x1xf32> to vector<8x256xf32>
    %39 = vector.broadcast %cst_8 : f32 to vector<8x256xf32>
    %40 = arith.select %35, %38, %39 : vector<8x256xi1>, vector<8x256xf32>
    %41 = arith.addf %32, %40 : vector<8x256xf32>
    %c4 = arith.constant 4 : index
    %42 = memref.load %arg2[%c4] : memref<8xf32, #tpu.memory_space<smem>>
    %43 = vector.broadcast %42 : f32 to vector<8x256xf32>
    %44 = arith.cmpf oge, %3, %43 : vector<8x256xf32>
    %45 = vector.extract_strided_slice %4 {offsets = [0, 4], sizes = [8, 1], strides = [1, 1]} : vector<8x8xf32> to vector<8x1xf32>
    %cst_9 = arith.constant 0.000000e+00 : f32
    %46 = vector.shape_cast %45 : vector<8x1xf32> to vector<8x1xf32>
    %47 = vector.broadcast %46 : vector<8x1xf32> to vector<8x256xf32>
    %48 = vector.broadcast %cst_9 : f32 to vector<8x256xf32>
    %49 = arith.select %44, %47, %48 : vector<8x256xi1>, vector<8x256xf32>
    %50 = arith.addf %41, %49 : vector<8x256xf32>
    %c5 = arith.constant 5 : index
    %51 = memref.load %arg2[%c5] : memref<8xf32, #tpu.memory_space<smem>>
    %52 = vector.broadcast %51 : f32 to vector<8x256xf32>
    %53 = arith.cmpf oge, %3, %52 : vector<8x256xf32>
    %54 = vector.extract_strided_slice %4 {offsets = [0, 5], sizes = [8, 1], strides = [1, 1]} : vector<8x8xf32> to vector<8x1xf32>
    %cst_10 = arith.constant 0.000000e+00 : f32
    %55 = vector.shape_cast %54 : vector<8x1xf32> to vector<8x1xf32>
    %56 = vector.broadcast %55 : vector<8x1xf32> to vector<8x256xf32>
    %57 = vector.broadcast %cst_10 : f32 to vector<8x256xf32>
    %58 = arith.select %53, %56, %57 : vector<8x256xi1>, vector<8x256xf32>
    %59 = arith.addf %50, %58 : vector<8x256xf32>
    %c6 = arith.constant 6 : index
    %60 = memref.load %arg2[%c6] : memref<8xf32, #tpu.memory_space<smem>>
    %61 = vector.broadcast %60 : f32 to vector<8x256xf32>
    %62 = arith.cmpf oge, %3, %61 : vector<8x256xf32>
    %63 = vector.extract_strided_slice %4 {offsets = [0, 6], sizes = [8, 1], strides = [1, 1]} : vector<8x8xf32> to vector<8x1xf32>
    %cst_11 = arith.constant 0.000000e+00 : f32
    %64 = vector.shape_cast %63 : vector<8x1xf32> to vector<8x1xf32>
    %65 = vector.broadcast %64 : vector<8x1xf32> to vector<8x256xf32>
    %66 = vector.broadcast %cst_11 : f32 to vector<8x256xf32>
    %67 = arith.select %62, %65, %66 : vector<8x256xi1>, vector<8x256xf32>
    %68 = arith.addf %59, %67 : vector<8x256xf32>
    %c7 = arith.constant 7 : index
    %69 = memref.load %arg2[%c7] : memref<8xf32, #tpu.memory_space<smem>>
    %70 = vector.broadcast %69 : f32 to vector<8x256xf32>
    %71 = arith.cmpf oge, %3, %70 : vector<8x256xf32>
    %72 = vector.extract_strided_slice %4 {offsets = [0, 7], sizes = [8, 1], strides = [1, 1]} : vector<8x8xf32> to vector<8x1xf32>
    %cst_12 = arith.constant 0.000000e+00 : f32
    %73 = vector.shape_cast %72 : vector<8x1xf32> to vector<8x1xf32>
    %74 = vector.broadcast %73 : vector<8x1xf32> to vector<8x256xf32>
    %75 = vector.broadcast %cst_12 : f32 to vector<8x256xf32>
    %76 = arith.select %71, %74, %75 : vector<8x256xi1>, vector<8x256xf32>
    %77 = arith.addf %68, %76 : vector<8x256xf32>
    %78 = math.tanh %3 : vector<8x256xf32>
    %c0_13 = arith.constant 0 : index
    %c0_14 = arith.constant 0 : index
    %79 = vector.load %arg5[%c0_13, %c0_14] : memref<8x1xf32, #tpu.memory_space<vmem>>, vector<8x1xf32>
    %80 = arith.mulf %78, %77 : vector<8x256xf32>
    %cst_15 = arith.constant dense<0.000000e+00> : vector<8xf32>
    %81 = vector.multi_reduction <add>, %80, %cst_15 [1] : vector<8x256xf32> to vector<8xf32>
    %82 = vector.shape_cast %81 : vector<8xf32> to vector<8x1xf32>
    %83 = arith.addf %79, %82 : vector<8x1xf32>
    %c0_16 = arith.constant 0 : index
    %c0_17 = arith.constant 0 : index
    %84 = vector.load %arg5[%c0_16, %c0_17] : memref<8x1xf32, #tpu.memory_space<vmem>>, vector<8x1xf32>
    tpu.vector_store %arg5[%c0_16, %c0_17], %83 {strides = array<i32>} : memref<8x1xf32, #tpu.memory_space<vmem>>, vector<8x1xf32>,
    return
  }
  func.func @transform_0(%arg0: i32, %arg1: i32, %arg2: memref<8xf32, #tpu.memory_space<smem>>) -> (i32, i32) {
    %c0_i32 = arith.constant 0 : i32
    return %arg0, %arg1 : i32, i32
  }
  func.func @transform_1(%arg0: i32, %arg1: i32, %arg2: memref<8xf32, #tpu.memory_space<smem>>) -> (i32, i32) {
    %c0_i32 = arith.constant 0 : i32
    %c0_i32_0 = arith.constant 0 : i32
    return %arg0, %c0_i32 : i32, i32
  }
  func.func @transform_2(%arg0: i32, %arg1: i32, %arg2: memref<8xf32, #tpu.memory_space<smem>>) -> (i32, i32) {
    %c0_i32 = arith.constant 0 : i32
    %c0_i32_0 = arith.constant 0 : i32
    return %arg0, %c0_i32 : i32, i32
  }
}

</mosaic_0001>

<bundles_post_ra>
// kernel: tpu_custom_call.1
= control target key start
LH: loop header
LB: loop body
LE: loop exit
PB: predicated region body
PF: predicated region fallthrough
CT: control target
= control target key end

     0   :  { %s406_s0 = inlined_call_operand.hbm [shape: f32[8], index: 0, kind: input, shape index: {}]   ;;  %s407_s1 = inlined_call_operand.hbm [shape: f32[8,256], index: 1, kind: input, shape index: {}]   ;;  %s408_s2 = inlined_call_operand.hbm [shape: f32[8,8], index: 2, kind: input, shape index: {}]   ;;  %s409_s3 = inlined_call_operand.vmem [shape: f32[8,1], index: 3, kind: output, shape index: {}]  }
   0x1   :  { %s195_s14 = scalar_lea.hbm %s406_s0, 16 }
   0x2   :  { %p196_p0 = scmp.ne.s32.totalorder %s406_s0, %s195_s14  ;;  %p199_p1 = scmp.lt.u32.totalorder %s195_s14, %s406_s0 }
   0x4   :  { %p201_p2 = pnand %p199_p1, %p196_p0 }
   0x6   :  { %204 = shalt.err (!%p201_p2)  }
   0x7   :  { %s255_s19 = smov [#allocation3]  }
   0x8   :  { %9 = dma.hbm_to_smem %s406_s0, 16, %s255_s19, [#allocation2] }
   0x9   :  { %249 = dma.done.wait [#allocation2], 16 }
   0xa   :  { %250 = vsyncadd [#allocation2], 4294967280 }
   0xb   :  { %11 = sfence }
   0xc   :  { %12 = vsyncpa [#allocation5], 0 }
   0xd   :  { %13 = vsyncpa [#allocation7], 0  ;;  %s256_s22 = smov [#allocation4]   ;;  %s257_s24 = smov [#allocation6]  }
   0xe   :  { %s20_s23 = sshll.u32 %s256_s22, 4  ;;  %s30_s25 = sshll.u32 %s257_s24, 4  ;;  %s21_s23 = int_to_ptr.vmem [resolvable:$true] %s20_s23  ;;  %s31_s25 = int_to_ptr.vmem [resolvable:$true] %s30_s25 }
   0xf   :  { %s205_s28 = scalar_lea.hbm %s407_s1, 256 }
  0x10   :  { %p206_p3 = scmp.ne.s32.totalorder %s407_s1, %s205_s28  ;;  %p209_p4 = scmp.lt.u32.totalorder %s205_s28, %s407_s1 }
  0x12   :  { %p211_p5 = pnand %p209_p4, %p206_p3 }
  0x14   :  { %214 = shalt.err (!%p211_p5)
}
  0x15   :  { %s215_s5 = scalar_lea.vmem %s21_s23, 256  ;;  %p220_p7 = scmp.lt.s32.totalorder %s21_s23, %s21_s23 }
  0x16   :  { %p216_p6 = scmp.ne.s32.totalorder %s21_s23, %s215_s5  ;;  %p221_p8 = scmp.lt.s32.totalorder %s215_s5, %s215_s5 }
  0x18   :  { %p222_p9 = por %p221_p8, %p220_p7 }
  0x1a   :  { %p223_p10 = pnand %p222_p9, %p216_p6 }
  0x1c   :  { %226 = shalt.err (!%p223_p10)
}
  0x1d   :  { %23 = dma.hbm_to_vmem [thread:$0]  %s407_s1, 256, %s21_s23, [#allocation5]  }
  0x1e   :  { %s227_s10 = scalar_lea.hbm %s408_s2, 128 }
  0x1f   :  { %p228_p11 = scmp.ne.s32.totalorder %s408_s2, %s227_s10  ;;  %p231_p12 = scmp.lt.u32.totalorder %s227_s10, %s408_s2 }
  0x21   :  { %p233_p13 = pnand %p231_p12, %p228_p11 }
  0x23   :  { %236 = shalt.err (!%p233_p13)
}
  0x24   :  { %s237_s15 = scalar_lea.vmem %s31_s25, 128  ;;  %p242_p1 = scmp.lt.s32.totalorder %s31_s25, %s31_s25 }
  0x25   :  { %p238_p0 = scmp.ne.s32.totalorder %s31_s25, %s237_s15  ;;  %p243_p2 = scmp.lt.s32.totalorder %s237_s15, %s237_s15 }
  0x27   :  { %p244_p3 = por %p243_p2, %p242_p1 }
  0x29   :  { %p245_p4 = pnand %p244_p3, %p238_p0 }
  0x2b   :  { %248 = shalt.err (!%p245_p4)
}
  0x2c   :  { %33 = dma.hbm_to_vmem [thread:$0]  %s408_s2, 128, %s31_s25, [#allocation7]  }
  0x2d   :  { %251 = dma.done.wait [#allocation5], 256  }
  0x2e   :  { %252 = vsyncadd [#allocation5], 4294967040 }
  0x2f   :  { %253 = dma.done.wait [#allocation7], 128  }
  0x30   :  { %254 = vsyncadd [#allocation7], 4294967168  ;;  %v258_v0 = vmov 2   ;;  %v259_v1 = vmov 0   ;;  %v48_v2 = vld [vmem:[#allocation6] sm:$0xff]  ;;  %v260_v3 = vmov 3  }
  0x31   :  { %184 = vset.pattern.permute.xlu1 %v258_v0  ;;  %182 = vset.pattern.permute.xlu0 %v259_v1  ;;  %v261_v4 = vmov 1   ;;  %v262_v5 = vmov 4   ;;  %v263_v6 = vmov 5   ;;  %v264_v7 = vmov 6   ;;  %s49_s18 = sld [smem:[#allocation3]]  ;;  %s163_s19 = sld [smem:[#allocation3 + $0x1]] }
  0x32   :  { %79 = vperm.xlu1 %184, %v48_v2   ;;  %55 = vperm.xlu0 %182, %v48_v2   ;;  %v265_v8 = vmov 7   ;;  %vm44_vm0 = vcmask 7168   ;;  %v266_v9 = vmov 0.0   ;;  %s164_s20 = sld [smem:[#allocation3 + $0x2]]  ;;  %s165_s21 = sld [smem:[#allocation3 + $0x3]]  ;;  %v46_v15 = vld [vmem:[#allocation4] sm:$0xff] }
  0x33   :  { %45 = vst.msk [vmem:[%s409_s3] sm:$0xff] %vm44_vm0, %v266_v9  ;;  %s327_s22 = sld [smem:[#allocation3 + $0x4]]  ;;  %s329_s23 = sld [smem:[#allocation3 + $0x5]]  ;;  %v47_v16 = vld [vmem:[#allocation4 + $0x8] sm:$0xff]  ;;  %191 = vtanh.f32 %v46_v15 }
  0x34   :  { %s331_s24 = sld [smem:[#allocation3 + $0x6]]  ;;  %s367_s25 = sld [smem:[#allocation3 + $0x7]]  ;;  %193 = vtanh.f32 %v47_v16 }
  0x36   :  { %185 = vset.pattern.permute.xlu1 %v260_v3  ;;  %183 = vset.pattern.permute.xlu0 %v261_v4 }
  0x37   :  { %91 = vperm.xlu1 %185, %v48_v2   ;;  %67 = vperm.xlu0 %183, %v48_v2   ;;  %v50_v11 = vstv %s49_s18  ;;  %v63_v13 = vstv %s163_s19 }
  0x38   :  { %v75_v14 = vstv %s164_s20  ;;  %v87_v17 = vstv %s165_s21  ;;  %vm333_vm1 = vcmp.ge.f32.partialorder %v46_v15, %v50_v11  ;;  %vm337_vm2 = vcmp.ge.f32.partialorder %v47_v16, %v50_v11 }
  0x39   :  { %vm64_vm3 = vcmp.ge.f32.partialorder %v46_v15, %v63_v13  ;;  %vm65_vm4 = vcmp.ge.f32.partialorder %v47_v16, %v63_v13  ;;  %v99_v20 = vstv %s327_s22  ;;  %vm342_vm5 = vcmp.ge.f32.partialorder %v46_v15, %v75_v14 }
  0x3a   :  { %vm346_vm6 = vcmp.ge.f32.partialorder %v47_v16, %v75_v14  ;;  %vm350_vm7 = vcmp.ge.f32.partialorder %v46_v15, %v87_v17  ;;  %v111_v26 = vstv %s329_s23  ;;  %vm359_vm8 = vcmp.ge.f32.partialorder %v47_v16, %v87_v17  ;;  %v148_v9 = vld [vmem:[%s409_s3] sm:$0xff] }
  0x3b   :  { %186 = vset.pattern.permute.xlu1 %v262_v5  ;;  %187 = vset.pattern.permute.xlu0 %v263_v6  ;;  %vm363_vm9 = vcmp.ge.f32.partialorder %v46_v15, %v99_v20  ;;  %vm373_vm10 = vcmp.ge.f32.partialorder %v47_v16, %v99_v20  ;;  %vm377_vm11 = vcmp.ge.f32.partialorder %v46_v15, %v111_v26  ;;  %v123_v46 = vstv %s331_s24 }
  0x3c   :  { %103 = vperm.xlu1 %186, %v48_v2   ;;  %115 = vperm.xlu0 %187, %v48_v2   ;;  %vm381_vm12 = vcmp.ge.f32.partialorder %v47_v16, %v111_v26  ;;  %vm124_vm13 = vcmp.ge.f32.partialorder %v46_v15, %v123_v46  ;;  %vm125_vm14 = vcmp.ge.f32.partialorder %v47_v16, %v123_v46  ;;  %v135_v56 = vstv %s367_s25 }
  0x3d   :  { %vm136_vm15 = vcmp.ge.f32.partialorder %v46_v15, %v135_v56  ;;  %v192_v61 = vpop.eup %191 }
  0x3e   :  { %v194_v62 = vpop.eup %193 }
  0x40   :  { %188 = vset.pattern.permute.xlu1 %v264_v7  ;;  %190 = vset.pattern.permute.xlu0 %v265_v8 }
  0x41   :  { %127 = vperm.xlu1 %188, %v48_v2  }
  0x45   :  { %189 = vset.pattern.permute.xlu1 %v265_v8 }
  0x46   :  { %139 = vperm.xlu1 %189, %v48_v2  }
  0xb1   :  { %v80_v10 = vpop.permute.xlu1 %79  ;;  %v56_v12 = vpop.permute.xlu0 %55 }
  0xb2   :  { %v58_v27 = vsel %vm333_vm1, %v56_v12, 0.0  ;;  %v59_v28 = vsel %vm337_vm2, %v56_v12, 0.0  ;;  %v82_v35 = vsel %vm342_vm5, %v80_v10, 0.0  ;;  %v83_v36 = vsel %vm346_vm6, %v80_v10, 0.0 }
  0xb3   :  { %vm137_vm1 = vcmp.ge.f32.partialorder %v47_v16, %v135_v56 }
  0xb6   :  { %v92_v23 = vpop.permute.xlu1 %91  ;;  %v68_v25 = vpop.permute.xlu0 %67 }
  0xb7   :  { %v70_v29 = vsel %vm64_vm3, %v68_v25, 0.0  ;;  %v71_v30 = vsel %vm65_vm4, %v68_v25, 0.0  ;;  %v94_v42 = vsel %vm350_vm7, %v92_v23, 0.0  ;;  %v95_v43 = vsel %vm359_vm8, %v92_v23, 0.0 }
  0xb8   :  { %v72_v32 = vadd.f32 %v70_v29, %v58_v27  ;;  %v73_v33 = vadd.f32 %v71_v30, %v59_v28 }
  0xba   :  { %v84_v39 = vadd.f32 %v82_v35, %v72_v32  ;;  %v85_v40 = vadd.f32 %v83_v36, %v73_v33 }
  0xbb   :  { %v104_v44 = vpop.permute.xlu1 %103  ;;  %v116_v45 = vpop.permute.xlu0 %115 }
  0xbc   :  { %v96_v47 = vadd.f32 %v94_v42, %v84_v39  ;;  %v97_v48 = vadd.f32 %v95_v43, %v85_v40  ;;  %v106_v49 = vsel %vm363_vm9, %v104_v44, 0.0  ;;  %v107_v50 = vsel %vm373_vm10, %v104_v44, 0.0 }
  0xbd   :  { %v118_v53 = vsel %vm377_vm11, %v116_v45, 0.0  ;;  %v119_v54 = vsel %vm381_vm12, %v116_v45, 0.0 }
  0xbe   :  { %v108_v51 = vadd.f32 %v106_v49, %v96_v47  ;;  %v109_v52 = vadd.f32 %v107_v50, %v97_v48 }
  0xc0   :  { %v128_v55 = vpop.permute.xlu1 %127  ;;  %v120_v57 = vadd.f32 %v118_v53, %v108_v51  ;;  %v121_v58 = vadd.f32 %v119_v54, %v109_v52 }
  0xc1   :  { %v130_v59 = vsel %vm124_vm13, %v128_v55, 0.0  ;;  %v131_v60 = vsel %vm125_vm14, %v128_v55, 0.0 }
  0xc2   :  { %v132_v63 = vadd.f32 %v130_v59, %v120_v57  ;;  %v133_v0 = vadd.f32 %v131_v60, %v121_v58 }
  0xc5   :  { %v140_v1 = vpop.permute.xlu1 %139 }
  0xc6   :  { %v142_v2 = vsel %vm136_vm15, %v140_v1, 0.0  ;;  %v143_v3 = vsel %vm137_vm1, %v140_v1, 0.0 }
  0xc7   :  { %v144_v4 = vadd.f32 %v142_v2, %v132_v63  ;;  %v145_v5 = vadd.f32 %v143_v3, %v133_v0 }
  0xc9   :  { %v149_v6 = vmul.f32 %v192_v61, %v144_v4  ;;  %v150_v7 = vmul.f32 %v194_v62, %v145_v5 }
  0xcb   :  { %v151_v8 = vadd.f32 %v150_v7, %v149_v6 }
  0xcd   :  { %152 = vadd.xlane.f32.xlu0 %v151_v8 }
 0x15a   :  { %v153_v10 = vpop.xlane.xlu0 %152 }
 0x15b   :  { %v154_v11 = vadd.f32 %v153_v10, %v148_v9 }
 0x15d   :  { %156 = vst.msk [vmem:[%s409_s3] sm:$0xff] %vm44_vm0, %v154_v11 }
 0x15e   :  { %161 = vsyncpa [#allocation5], 1 }
 0x15f   :  { %162 = vsyncpa [#allocation7], 1 }

</bundles_post_ra>
